<compile_context>
chip_gen: v7x
topology: tpu7x:2x2x1
jax: 0.10.0
libtpu: 0.0.40
codegen_flags: <defaults>
</compile_context>

<pallas_src>
import functools

import jax
import jax.numpy as jnp
import numpy as np
from jax.experimental import pallas as pl
from jax.experimental.pallas import tpu as pltpu

LANE = 128
SUBLANE = 8


def _round_up(n, m):
    return ((n + m - 1) // m) * m


def rbfn_kernel(x_ref, c_ref, beta_ref, csq_ref, wx_ref, wr_ref, b_ref, o_ref,
                *, mxu_dtype):
    x = x_ref[...]                                    # [TN, D]  f32
    c = c_ref[...]                                    # [Cp, D]  f32

    # ||x - c||^2 = ||x||^2 + ||c||^2 - 2 x.c   (dominant O(TN*Cp*D) work on the MXU)
    xsq = jnp.sum(x * x, axis=1, keepdims=True)       # [TN, 1]
    xc = jnp.dot(x.astype(mxu_dtype), c.astype(mxu_dtype).T,
                 preferred_element_type=jnp.float32)  # [TN, Cp]
    sq = xsq + csq_ref[...] - 2.0 * xc                # [TN, Cp]

    # Gaussian RBF: one VPU mul + one EUP exp per element (EUP slot is otherwise idle).
    radial = jnp.exp(-beta_ref[...] * sq)             # [TN, Cp] f32

    # Linear(concat([x, radial])) == x @ Wx + radial @ Wr + b  (two MXU matmuls).
    out = (jnp.dot(x.astype(mxu_dtype), wx_ref[...].astype(mxu_dtype),
                   preferred_element_type=jnp.float32)
           + jnp.dot(radial.astype(mxu_dtype), wr_ref[...].astype(mxu_dtype),
                     preferred_element_type=jnp.float32)
           + b_ref[...])                              # [TN, Op]
    o_ref[...] = out.astype(o_ref.dtype)


def rbfn_forward(x, centers, beta, w, b, *, tile_n=256, mxu_dtype=jnp.float32):
    """RBFN forward pass.

    x: [N, D], centers: [C, D], beta: [1, C], w: [n_out, D + C], b: [n_out].
    tile_n: batch tile (rows per grid step). 512-1024 is a good target on
            v5e/v6e (128 MiB VMEM); halve on v7x (64 MiB VMEM). 256 default is
            a safe cross-generation choice; tiny inputs shrink it automatically.
    """
    N, D = x.shape
    C = centers.shape[0]
    n_out = w.shape[0]

    # Lane-dense padding of C and n_out to multiples of 128.
    Cp = _round_up(C, LANE)
    Op = _round_up(n_out, LANE)

    centers_p = jnp.zeros((Cp, D), jnp.float32).at[:C, :].set(centers.astype(jnp.float32))
    beta_p = jnp.zeros((1, Cp), jnp.float32).at[:, :C].set(beta.astype(jnp.float32))
    # Precompute ||c||^2 once in the wrapper (padded rows are zero).
    csq = jnp.sum(centers_p * centers_p, axis=1, keepdims=True).T        # [1, Cp]

    # Split the Linear weight at trace time; pad with exact zeros.
    w = w.astype(jnp.float32)
    wx = jnp.zeros((D, Op), jnp.float32).at[:, :n_out].set(w[:, :D].T)   # [D, Op]
    wr = jnp.zeros((Cp, Op), jnp.float32).at[:C, :n_out].set(w[:, D:].T)  # [Cp, Op]
    b_p = jnp.zeros((1, Op), jnp.float32).at[:, :n_out].set(b.astype(jnp.float32))

    # Tile over batch; pad N so every tile is full (stores stay unmasked).
    TN = _round_up(min(tile_n, _round_up(N, SUBLANE)), SUBLANE)
    Np = _round_up(N, TN)
    x_p = jnp.zeros((Np, D), jnp.float32).at[:N, :].set(x.astype(jnp.float32))

    grid = (Np // TN,)

    cost = pl.CostEstimate(
        flops=2 * Np * Cp * D + 2 * Np * (D + Cp) * Op,
        transcendentals=Np * Cp,
        bytes_accessed=4 * (Np * D + Cp * D + 2 * Cp + D * Op + Cp * Op + Op + Np * Op),
    )

    def const(shape):
        return pl.BlockSpec(shape, lambda i: (0, 0))

    out = pl.pallas_call(
        functools.partial(rbfn_kernel, mxu_dtype=mxu_dtype),
        out_shape=jax.ShapeDtypeStruct((Np, Op), jnp.float32),
        grid=grid,
        in_specs=[
            pl.BlockSpec((TN, D), lambda i: (i, 0)),   # x tile (pipelined over N)
            const((Cp, D)),                            # centers   (resident)
            const((1, Cp)),                            # beta      (resident)
            const((1, Cp)),                            # ||c||^2   (resident)
            const((D, Op)),                            # Wx        (resident)
            const((Cp, Op)),                           # Wr        (resident)
            const((1, Op)),                            # bias      (resident)
        ],
        out_specs=pl.BlockSpec((TN, Op), lambda i: (i, 0)),
        compiler_params=pltpu.CompilerParams(
            dimension_semantics=("parallel",),         # megacore sharding on v7x
        ),
        cost_estimate=cost,
    )(x_p, centers_p, beta_p, csq, wx, wr, b_p)

    return out[:N, :n_out]


def rbfn_reference(x, centers, beta, w, b):
    """Pure-JAX reference mirroring the PyTorch forward."""
    diff = centers[None, :, :] - x[:, None, :]
    sq = jnp.sum(diff * diff, axis=2)
    radial = jnp.exp(-beta * sq)
    feat = jnp.concatenate([x, radial], axis=1)
    return feat @ w.T + b


if __name__ == "__main__":
    # Small shapes consistent with the module: N batch points of dim D,
    # C RBF centers, n_out output classes.
    N, D, C, n_out = 20, 16, 32, 3

    key = jax.random.PRNGKey(0)
    k_x, k_c, k_w = jax.random.split(key, 3)

    x = jax.random.normal(k_x, (N, D), dtype=jnp.float32)
    centers = jax.random.normal(k_c, (C, D), dtype=jnp.float32)        # nn.Parameter(centers)
    beta = jnp.ones((1, C), dtype=jnp.float32) * 0.2                   # torch.ones(1, C) * 0.2
    # nn.Linear(C + D, n_out): weight ~ N(0, 0.02), bias = 0 (initialize_weights)
    w = 0.02 * jax.random.normal(k_w, (n_out, D + C), dtype=jnp.float32)
    b = jnp.zeros((n_out,), dtype=jnp.float32)

    ref = rbfn_reference(x, centers, beta, w, b)

    # Multi-tile path (tile_n=8 -> 3 grid steps, incl. a padded last tile), f32 MXU.
    out = jax.block_until_ready(rbfn_forward(x, centers, beta, w, b, tile_n=8))
    np.testing.assert_allclose(np.asarray(out), np.asarray(ref), rtol=1e-5, atol=1e-5)

    # Single-tile default path, f32 MXU.
    out1 = jax.block_until_ready(rbfn_forward(x, centers, beta, w, b))
    np.testing.assert_allclose(np.asarray(out1), np.asarray(ref), rtol=1e-5, atol=1e-5)

    # bf16-MXU path (v6e/v7x): f32 accumulation; loose tolerance for reduced precision.
    out_bf16 = jax.block_until_ready(
        rbfn_forward(x, centers, beta, w, b, mxu_dtype=jnp.bfloat16))
    np.testing.assert_allclose(np.asarray(out_bf16), np.asarray(ref), rtol=5e-2, atol=5e-2)

    print("KERNEL_OK")
</pallas_src>

<mosaic_0001>
module attributes {stable_mosaic.version = 11 : i64} {
  func.func @rbfn_kernel(%arg0: i32, %arg1: memref<8x16xf32, #tpu.memory_space<vmem>>, %arg2: memref<128x16xf32, #tpu.memory_space<vmem>>, %arg3: memref<1x128xf32, #tpu.memory_space<vmem>>, %arg4: memref<1x128xf32, #tpu.memory_space<vmem>>, %arg5: memref<16x128xf32, #tpu.memory_space<vmem>>, %arg6: memref<128x128xf32, #tpu.memory_space<vmem>>, %arg7: memref<1x128xf32, #tpu.memory_space<vmem>>, %arg8: memref<8x128xf32, #tpu.memory_space<vmem>>) attributes {dimension_semantics = [#tpu.dimension_semantics<parallel>], iteration_bounds = array<i64: 3>, scalar_prefetch = 0 : i64, scratch_operands = 0 : i64, tpu.core_type = #tpu.core_type<tc>, window_params = [{transform_indices = @transform_0, window_bounds = array<i64: 8, 16>}, {pipeline_mode = #tpu.pipeline_mode<synchronous>, transform_indices = @transform_1, window_bounds = array<i64: 128, 16>}, {pipeline_mode = #tpu.pipeline_mode<synchronous>, transform_indices = @transform_2, window_bounds = array<i64: 1, 128>}, {pipeline_mode = #tpu.pipeline_mode<synchronous>, transform_indices = @transform_3, window_bounds = array<i64: 1, 128>}, {pipeline_mode = #tpu.pipeline_mode<synchronous>, transform_indices = @transform_4, window_bounds = array<i64: 16, 128>}, {pipeline_mode = #tpu.pipeline_mode<synchronous>, transform_indices = @transform_5, window_bounds = array<i64: 128, 128>}, {pipeline_mode = #tpu.pipeline_mode<synchronous>, transform_indices = @transform_6, window_bounds = array<i64: 1, 128>}, {transform_indices = @transform_7, window_bounds = array<i64: 8, 128>}]} {
    %c0 = arith.constant 0 : index
    %c0_0 = arith.constant 0 : index
    %0 = vector.load %arg1[%c0, %c0_0] : memref<8x16xf32, #tpu.memory_space<vmem>>, vector<8x16xf32>
    %c0_1 = arith.constant 0 : index
    %c0_2 = arith.constant 0 : index
    %1 = vector.load %arg2[%c0_1, %c0_2] : memref<128x16xf32, #tpu.memory_space<vmem>>, vector<128x16xf32>
    %2 = arith.mulf %0, %0 : vector<8x16xf32>
    %cst = arith.constant dense<0.000000e+00> : vector<8xf32>
    %3 = vector.multi_reduction <add>, %2, %cst [1] : vector<8x16xf32> to vector<8xf32>
    %4 = vector.shape_cast %3 : vector<8xf32> to vector<8x1xf32>
    %5 = tpu.transpose %1, [1, 0] : vector<128x16xf32> -> vector<16x128xf32>
    %cst_3 = arith.constant dense<0.000000e+00> : vector<8x128xf32>
    %6 = tpu.matmul %0, %5, %cst_3 {dimension_numbers = #tpu.dot_dimension_numbers<[1], [0], [0], [1], [0, 0, 1, 1], [], []>} : vector<8x16xf32>, vector<16x128xf32>, vector<8x128xf32> -> vector<8x128xf32>
    %c0_4 = arith.constant 0 : index
    %c0_5 = arith.constant 0 : index
    %7 = vector.load %arg4[%c0_4, %c0_5] : memref<1x128xf32, #tpu.memory_space<vmem>>, vector<1x128xf32>
    %8 = vector.broadcast %4 : vector<8x1xf32> to vector<8x128xf32>
    %9 = vector.broadcast %7 : vector<1x128xf32> to vector<8x128xf32>
    %10 = arith.addf %8, %9 : vector<8x128xf32>
    %cst_6 = arith.constant 2.000000e+00 : f32
    %11 = vector.broadcast %cst_6 : f32 to vector<8x128xf32>
    %12 = arith.mulf %11, %6 : vector<8x128xf32>
    %13 = arith.subf %10, %12 : vector<8x128xf32>
    %c0_7 = arith.constant 0 : index
    %c0_8 = arith.constant 0 : index
    %14 = vector.load %arg3[%c0_7, %c0_8] : memref<1x128xf32, #tpu.memory_space<vmem>>, vector<1x128xf32>
    %cst_9 = arith.constant 0.000000e+00 : f32
    %15 = vector.broadcast %cst_9 : f32 to vector<1x128xf32>
    %16 = arith.subf %15, %14 : vector<1x128xf32>
    %17 = vector.broadcast %16 : vector<1x128xf32> to vector<8x128xf32>
    %18 = arith.mulf %17, %13 : vector<8x128xf32>
    %19 = math.exp %18 : vector<8x128xf32>
    %c0_10 = arith.constant 0 : index
    %c0_11 = arith.constant 0 : index
    %20 = vector.load %arg5[%c0_10, %c0_11] : memref<16x128xf32, #tpu.memory_space<vmem>>, vector<16x128xf32>
    %cst_12 = arith.constant dense<0.000000e+00> : vector<8x128xf32>
    %21 = tpu.matmul %0, %20, %cst_12 {dimension_numbers = #tpu.dot_dimension_numbers<[1], [0], [0], [1], [0, 0, 1, 1], [], []>} : vector<8x16xf32>, vector<16x128xf32>, vector<8x128xf32> -> vector<8x128xf32>
    %c0_13 = arith.constant 0 : index
    %c0_14 = arith.constant 0 : index
    %22 = vector.load %arg6[%c0_13, %c0_14] : memref<128x128xf32, #tpu.memory_space<vmem>>, vector<128x128xf32>
    %cst_15 = arith.constant dense<0.000000e+00> : vector<8x128xf32>
    %23 = tpu.matmul %19, %22, %cst_15 {dimension_numbers = #tpu.dot_dimension_numbers<[1], [0], [0], [1], [0, 0, 1, 1], [], []>} : vector<8x128xf32>, vector<128x128xf32>, vector<8x128xf32> -> vector<8x128xf32>
    %24 = arith.addf %21, %23 : vector<8x128xf32>
    %c0_16 = arith.constant 0 : index
    %c0_17 = arith.constant 0 : index
    %25 = vector.load %arg7[%c0_16, %c0_17] : memref<1x128xf32, #tpu.memory_space<vmem>>, vector<1x128xf32>
    %26 = vector.broadcast %25 : vector<1x128xf32> to vector<8x128xf32>
    %27 = arith.addf %24, %26 : vector<8x128xf32>
    %c0_18 = arith.constant 0 : index
    %c0_19 = arith.constant 0 : index
    %28 = vector.load %arg8[%c0_18, %c0_19] : memref<8x128xf32, #tpu.memory_space<vmem>>, vector<8x128xf32>
    tpu.vector_store %arg8[%c0_18, %c0_19], %27 {strides = array<i32>} : memref<8x128xf32, #tpu.memory_space<vmem>>, vector<8x128xf32>,
    return
  }
  func.func @transform_0(%arg0: i32) -> (i32, i32) {
    %c0_i32 = arith.constant 0 : i32
    %c0_i32_0 = arith.constant 0 : i32
    return %arg0, %c0_i32 : i32, i32
  }
  func.func @transform_1(%arg0: i32) -> (i32, i32) {
    %c0_i32 = arith.constant 0 : i32
    %c0_i32_0 = arith.constant 0 : i32
    %c0_i32_1 = arith.constant 0 : i32
    return %c0_i32, %c0_i32_0 : i32, i32
  }
  func.func @transform_2(%arg0: i32) -> (i32, i32) {
    %c0_i32 = arith.constant 0 : i32
    %c0_i32_0 = arith.constant 0 : i32
    %c0_i32_1 = arith.constant 0 : i32
    return %c0_i32, %c0_i32_0 : i32, i32
  }
  func.func @transform_3(%arg0: i32) -> (i32, i32) {
    %c0_i32 = arith.constant 0 : i32
    %c0_i32_0 = arith.constant 0 : i32
    %c0_i32_1 = arith.constant 0 : i32
    return %c0_i32, %c0_i32_0 : i32, i32
  }
  func.func @transform_4(%arg0: i32) -> (i32, i32) {
    %c0_i32 = arith.constant 0 : i32
    %c0_i32_0 = arith.constant 0 : i32
    %c0_i32_1 = arith.constant 0 : i32
    return %c0_i32, %c0_i32_0 : i32, i32
  }
  func.func @transform_5(%arg0: i32) -> (i32, i32) {
    %c0_i32 = arith.constant 0 : i32
    %c0_i32_0 = arith.constant 0 : i32
    %c0_i32_1 = arith.constant 0 : i32
    return %c0_i32, %c0_i32_0 : i32, i32
  }
  func.func @transform_6(%arg0: i32) -> (i32, i32) {
    %c0_i32 = arith.constant 0 : i32
    %c0_i32_0 = arith.constant 0 : i32
    %c0_i32_1 = arith.constant 0 : i32
    return %c0_i32, %c0_i32_0 : i32, i32
  }
  func.func @transform_7(%arg0: i32) -> (i32, i32) {
    %c0_i32 = arith.constant 0 : i32
    %c0_i32_0 = arith.constant 0 : i32
    return %arg0, %c0_i32 : i32, i32
  }
}

</mosaic_0001>

<bundles_post_ra>
// kernel: tpu_custom_call.1
= control target key start
LH: loop header
LB: loop body
LE: loop exit
PB: predicated region body
PF: predicated region fallthrough
CT: control target
= control target key end

     0   :  { %12 = vsyncpa [#allocation3], 0  ;;  %s1298_s0 = inlined_call_operand.vmem [shape: f32[24,16], index: 0, kind: input, shape index: {}]   ;;  %s1299_s1 = inlined_call_operand.vmem [shape: f32[128,16], index: 1, kind: input, shape index: {}]   ;;  %s1300_s2 = inlined_call_operand.vmem [shape: f32[1,128], index: 2, kind: input, shape index: {}]   ;;  %s1301_s3 = inlined_call_operand.vmem [shape: f32[1,128], index: 3, kind: input, shape index: {}]   ;;  %s1302_s4 = inlined_call_operand.vmem [shape: f32[16,128], index: 4, kind: input, shape index: {}]   ;;  %s1303_s5 = inlined_call_operand.vmem [shape: f32[128,128], index: 5, kind: input, shape index: {}]   ;;  %s1304_s6 = inlined_call_operand.vmem [shape: f32[1,128], index: 6, kind: input, shape index: {}]   ;;  %s1305_s7 = inlined_call_operand.hbm [shape: f32[24,128], index: 7, kind: output, shape index: {}]  }
   0x1   :  { %14 = vsyncpa [#allocation3 + $0x1], 0  ;;  %s1033_s24 = smov 0   ;;  %s1035_s25 = smov 0  }
   0x2   :  { %s1037_s26 = smov 0   ;;  %s1039_s27 = smov 0  }
   0x3 LB: > { %s1054_s28 = sadd.s32 4294967295, %s987_s27   ;;  %s678_s29 = sadd.s32 4294967294, %s987_s27   ;;  %s987_s27 = sphi %s1039_s27, %s1313_s27   ;;  %s983_s26 = sphi %s1037_s26, %s1312_s26   ;;  %s979_s25 = sphi %s1035_s25, %s1311_s25   ;;  %s975_s24 = sphi %s1033_s24, %s1310_s24  }
   0x4   : > { %s1058_s30 = sadd.s32 1, %s987_s27   ;;  %s179_s8 = sadd.s32 1, %s983_s26 }
   0x5   : > { %s176_s9 = ssub.s32 %s987_s27, %s1058_s30  ;;  %p189_p0 = scmp.ne.s32.totalorder %s983_s26, %s979_s25 }
   0x6   : > { %p177_p1 = scmp.eq.s32.totalorder %s176_s9, 0  ;;  %p190_p2 = scmp.eq.s32.totalorder %s1054_s28, 2 }
   0x7   : > { %p195_p3 = scmp.ne.s32.totalorder %s979_s25, %s975_s24  ;;  %p196_p4 = scmp.eq.s32.totalorder %s678_s29, 2 }
   0x8   : > { %s1069_s10 = scalar_select %p177_p1, %s983_s26, %s179_s8  }
   0x9   : > { %p1071_p5 = por %p190_p2, %p189_p0  ;;  %p1075_p6 = por %p196_p4, %p195_p3 }
   0xa   : > { %p681_p7 = scmp.ge.s32.totalorder %s987_s27, 1  ;;  %p239_p8 = scmp.lt.s32.totalorder %s987_s27, 4 }
   0xc   : > { %p240_p9 = pnand %p681_p7, %p239_p8 }
   0xd   : > { %v275_v0 = vld [vmem:[%s1299_s1] sm:$0xff] (!%p240_p9)  ;;  %v276_v1 = vld [vmem:[%s1299_s1 + $0x8] sm:$0xff] (!%p240_p9)  ;;  %vm292_vm0 = vcmask (!%p240_p9), 130048   ;;  %v989_v2 = vmov (!%p240_p9), 0.0|0.0   ;;  %p270_p10 = scmp.lt.s32.totalorder (!%p240_p9), %s1054_s28, 2  ;;  %vm990_vm2 = vmmov (!%p240_p9), 0   ;;  %v430_v54 = vlaneseq (!%p240_p9) }
   0xe   : > { %243 = sbr.rel (%p240_p9) target bundleno = 544 (0x220), region = 48  ;;  %822 = vmatprep.subr.bf16.mxu0 (!%p240_p9), %v989_v2  ;;  %v823_v3 = vpack.c.bf16 (!%p240_p9), %v276_v1, %v275_v0  ;;  %vm1090_vm1 = vmpackc.low (!%p240_p9), %vm292_vm0, %vm292_vm0  ;;  %854 = vmatprep.subr.bf16.mxu1 (!%p240_p9), %v989_v2  ;;  %v991_v5 = vmov (!%p240_p9), 0.0   ;;  %v277_v6 = vld [vmem:[%s1299_s1 + $0x10] sm:$0xff] (!%p240_p9)  ;;  %v278_v7 = vld [vmem:[%s1299_s1 + $0x18] sm:$0xff] (!%p240_p9)  ;;  %s705_s29 = sshll.u32 (!%p240_p9), %s1054_s28, 7 }
   0xf   : > { %777 = vmatprep.mubr.msk.f32.mxu0 (!%p240_p9), %vm990_vm2, %v991_v5  ;;  %812 = vmatprep.mubr.msk.f32.mxu1 (!%p240_p9), %vm990_vm2, %v991_v5  ;;  %v440_v8 = vld [vmem:[%s1303_s5] sm:$0xff] (!%p240_p9)  ;;  %v441_v9 = vld [vmem:[%s1303_s5 + $0x8] sm:$0xff] (!%p240_p9)  ;;  %v442_v10 = vld [vmem:[%s1303_s5 + $0x10] sm:$0xff] (!%p240_p9)  ;;  %v827_v12 = vpack.c.bf16 (!%p240_p9), %v278_v7, %v277_v6  ;;  %v431_v55 = vshrl.u32 (!%p240_p9), %v430_v54, 7  ;;  %s1256_s15 = scalar_lea.hbm (!%p240_p9), %s1305_s7, %s705_s29 }
  0x10   : > { %825 = vmatpush3.bf16.xpose.msk.msra.mxu0 (!%p240_p9), %vm1090_vm1, %v823_v3  ;;  %v443_v11 = vld [vmem:[%s1303_s5 + $0x18] sm:$0xff] (!%p240_p9)  ;;  %v855_v14 = vpack.c.bf16 (!%p240_p9), %v441_v9, %v440_v8  ;;  %v444_v18 = vld [vmem:[%s1303_s5 + $0x20] sm:$0xff] (!%p240_p9)  ;;  %v445_v19 = vld [vmem:[%s1303_s5 + $0x28] sm:$0xff] (!%p240_p9) }
  0x11   : > { %826 = vmatprep.subr.bf16.mxu0 (!%p240_p9), %v989_v2  ;;  %v858_v16 = vpack.c.bf16 (!%p240_p9), %v443_v11, %v442_v10  ;;  %v279_v20 = vld [vmem:[%s1299_s1 + $0x20] sm:$0xff] (!%p240_p9)  ;;  %v280_v21 = vld [vmem:[%s1299_s1 + $0x28] sm:$0xff] (!%p240_p9)  ;;  %v861_v22 = vpack.c.bf16 (!%p240_p9), %v445_v19, %v444_v18  ;;  %v281_v24 = vld [vmem:[%s1299_s1 + $0x30] sm:$0xff] (!%p240_p9)  ;;  %v432_v60 = vsub.s32 (!%p240_p9), 0, %v431_v55 }
  0x12   : > { %856 = vmatpush3.bf16.msra.mxu1 (!%p240_p9), %v855_v14  ;;  %v831_v23 = vpack.c.bf16 (!%p240_p9), %v280_v21, %v279_v20  ;;  %v282_v25 = vld [vmem:[%s1299_s1 + $0x38] sm:$0xff] (!%p240_p9)  ;;  %v283_v27 = vld [vmem:[%s1299_s1 + $0x40] sm:$0xff] (!%p240_p9)  ;;  %v284_v28 = vld [vmem:[%s1299_s1 + $0x48] sm:$0xff] (!%p240_p9) }
  0x13   : > { %857 = vmatprep.subr.bf16.mxu1 (!%p240_p9), %v989_v2  ;;  %v835_v26 = vpack.c.bf16 (!%p240_p9), %v282_v25, %v281_v24  ;;  %v839_v29 = vpack.c.bf16 (!%p240_p9), %v284_v28, %v283_v27  ;;  %v285_v30 = vld [vmem:[%s1299_s1 + $0x50] sm:$0xff] (!%p240_p9)  ;;  %v286_v31 = vld [vmem:[%s1299_s1 + $0x58] sm:$0xff] (!%p240_p9)  ;;  %v287_v33 = vld [vmem:[%s1299_s1 + $0x60] sm:$0xff] (!%p240_p9) }
  0x14   : > { %v843_v32 = vpack.c.bf16 (!%p240_p9), %v286_v31, %v285_v30  ;;  %v288_v34 = vld [vmem:[%s1299_s1 + $0x68] sm:$0xff] (!%p240_p9)  ;;  %v289_v36 = vld [vmem:[%s1299_s1 + $0x70] sm:$0xff] (!%p240_p9)  ;;  %v290_v37 = vld [vmem:[%s1299_s1 + $0x78] sm:$0xff] (!%p240_p9) }
  0x15   : > { %s271_s17 = scalar_select %p270_p10, %s1054_s28, 2  ;;  %v847_v35 = vpack.c.bf16 %v288_v34, %v287_v33  ;;  %v851_v38 = vpack.c.bf16 %v290_v37, %v289_v36  ;;  %v446_v39 = vld [vmem:[%s1303_s5 + $0x30] sm:$0xff]  ;;  %v447_v40 = vld [vmem:[%s1303_s5 + $0x38] sm:$0xff]  ;;  %v448_v42 = vld [vmem:[%s1303_s5 + $0x40] sm:$0xff] }
  0x16   : > { %859 = vmatpush3.bf16.msra.mxu1 %v858_v16  ;;  %v864_v41 = vpack.c.bf16 %v447_v40, %v446_v39  ;;  %v449_v43 = vld [vmem:[%s1303_s5 + $0x48] sm:$0xff]  ;;  %v450_v45 = vld [vmem:[%s1303_s5 + $0x50] sm:$0xff]  ;;  %v451_v46 = vld [vmem:[%s1303_s5 + $0x58] sm:$0xff]  ;;  %s992_s28 = smov [#allocation2]  }
  0x17   : > { %s683_s22 = sshll.u32 %s271_s17, 3  ;;  %860 = vmatprep.subr.bf16.mxu1 %v989_v2  ;;  %v867_v44 = vpack.c.bf16 %v449_v43, %v448_v42  ;;  %v870_v47 = vpack.c.bf16 %v451_v46, %v450_v45  ;;  %v452_v48 = vld [vmem:[%s1303_s5 + $0x60] sm:$0xff]  ;;  %v453_v49 = vld [vmem:[%s1303_s5 + $0x68] sm:$0xff]  ;;  %v454_v51 = vld [vmem:[%s1303_s5 + $0x70] sm:$0xff]  ;;  %s267_s17 = sand.u32 1, %s979_s25  }
  0x18   : > { %s273_s13 = scalar_lea.vmem %s1298_s0, %s683_s22  ;;  %829 = vmatpush3.bf16.xpose.msk.msra.mxu0 %vm1090_vm1, %v827_v12  ;;  %v873_v50 = vpack.c.bf16 %v453_v49, %v452_v48  ;;  %v455_v52 = vld [vmem:[%s1303_s5 + $0x78] sm:$0xff]  ;;  %v427_v56 = vld [vmem:[%s1300_s2] sm:$0x1]  ;;  %v439_v7 = vld [vmem:[%s1302_s4 + $0x8] sm:$0xff]  ;;  %s682_s21 = sshll.u32 %s267_s17, 3 }
  0x19   : > { %v1125_v13 = vld [vmem:[%s273_s13] sm:$0xff]  ;;  %830 = vmatprep.subr.bf16.mxu0 %v989_v2  ;;  %v876_v53 = vpack.c.bf16 %v455_v52, %v454_v51  ;;  %v428_v59 = vsub.f32 0.0, %v427_v56  ;;  %s269_s8 = scalar_lea.vmem [#allocation2], %s682_s21  ;;  %s606_s16 = scalar_lea.sflag [#allocation3], %s267_s17 }
  0x1a   : > { %v291_v15 = vmul.f32 %v1125_v13, %v1125_v13  ;;  %862 = vmatpush3.bf16.msra.mxu1 %v861_v22  ;;  %v701_v58 = vld [vmem:[%s1301_s3] ss:$0 sm:$0xff]  ;;  %s619_s9 = sshll.u32 %s269_s8, 4  ;;  %s929_s19 = sshll.u32 %s992_s28, 4  ;;  %s1258_s9 = int_to_ptr.vmem [resolvable:$true] %s619_s9  ;;  %s930_s19 = int_to_ptr.vmem [resolvable:$false] %s929_s19 }
  0x1b   : > { %863 = vmatprep.subr.bf16.mxu1 %v989_v2  ;;  %v433_v0 = vrot.slane %v428_v59, %v432_v60  ;;  %v438_v6 = vld [vmem:[%s1302_s4] sm:$0xff]  ;;  %s925_s18 = scalar_lea.vmem %s1258_s9, 128  ;;  %s931_s20 = scalar_lea.vmem %s930_s19, 256 }
  0x1c   : > { %v293_v17 = vsel %vm292_vm0, %v291_v15, 0.0  ;;  %v879_v8 = vpack.c.bf16 %v439_v7, %v438_v6  ;;  %v703_v14 = vld [vmem:[%s1304_s6] ss:$0 sm:$0xff]  ;;  %p926_p11 = scmp.ne.s32.totalorder %s1258_s9, %s925_s18  ;;  %p932_p0 = scmp.lt.s32.totalorder %s1258_s9, %s930_s19 }
  0x1d   : > { %294 = vadd.xlane.f32.xlu0 %v293_v17  ;;  %p933_p1 = scmp.lt.s32.totalorder %s931_s20, %s925_s18 }
  0x1e   : > { %865 = vmatpush3.bf16.msra.mxu1 %v864_v41  ;;  %p927_p12 = pnand %p926_p11, %p1071_p5 }
  0x1f   : > { %866 = vmatprep.subr.bf16.mxu1 %v989_v2  ;;  %p934_p2 = por %p933_p1, %p932_p0 }
  0x20   : > { %833 = vmatpush3.bf16.xpose.msk.msra.mxu0 %vm1090_vm1, %v831_v23  ;;  %p928_p13 = pneg %p927_p12 }
  0x21   : > { %834 = vmatprep.subr.bf16.mxu0 %v989_v2 }
  0x22   : > { %868 = vmatpush3.bf16.msra.mxu1 %v867_v44  ;;  %p935_p3 = pnand %p934_p2, %p928_p13 }
  0x23   : > { %869 = vmatprep.subr.bf16.mxu1 %v989_v2 }
  0x26   : > { %871 = vmatpush3.bf16.msra.mxu1 %v870_v47 }
  0x27   : > { %872 = vmatprep.subr.bf16.mxu1 %v989_v2 }
  0x28   : > { %837 = vmatpush3.bf16.xpose.msk.msra.mxu0 %vm1090_vm1, %v835_v26 }
  0x29   : > { %838 = vmatprep.subr.bf16.mxu0 %v989_v2 }
  0x2a   : > { %874 = vmatpush3.bf16.msra.mxu1 %v873_v50 }
  0x2b   : > { %875 = vmatprep.subr.bf16.mxu1 %v989_v2 }
  0x2e   : > { %877 = vmatpush3.bf16.msra.mxu1 %v876_v53 }
  0x2f   : > { %878 = vmatprep.subr.bf16.mxu1 %v989_v2 }
  0x30   : > { %841 = vmatpush3.bf16.xpose.msk.msra.mxu0 %vm1090_vm1, %v839_v29 }
  0x31   : > { %842 = vmatprep.subr.bf16.mxu0 %v989_v2 }
  0x38   : > { %845 = vmatpush3.bf16.xpose.msk.msra.mxu0 %vm1090_vm1, %v843_v32 }
  0x39   : > { %846 = vmatprep.subr.bf16.mxu0 %v989_v2 }
  0x40   : > { %849 = vmatpush3.bf16.xpose.msk.msra.mxu0 %vm1090_vm1, %v847_v35 }
  0x41   : > { %850 = vmatprep.subr.bf16.mxu0 %v989_v2 }
  0x48   : > { %853 = vmatpush3.bf16.xpose.msk.msra.mxu0 %vm1090_vm1, %v851_v38 }
  0x4f   : > { %778 = vmatmul.mubr.msk.f32.vlgmr.msra.gmra.mrb[0].mxu0 %vm292_vm0, %v1125_v13 }
  0xaa   : > { %v295_v57 = vpop.xlane.xlu0 %294 }
  0xab   : > { %v424_v61 = vadd.f32 %v701_v58, %v295_v57 }
 0x122   : > { %v413_v62 = vpop.f32.mrb[0].mxu0 }
 0x123   : > { %v425_v63 = vmul.f32 2.0, %v413_v62  ;;  %v779_v1 = vpop.f32.mrb[1].mxu0 }
 0x125   : > { %v426_v2 = vsub.f32 %v424_v61, %v425_v63 }
 0x127   : > { %v435_v3 = vmul.f32 %v433_v0, %v426_v2 }
 0x129   : > { %v436_v4 = vmul.f32 1.442695, %v435_v3 }
 0x12b   : > { %923 = vpow2.f32 %v436_v4 }
 0x135   : > { %v924_v9 = vpop.eup %923 }
 0x136   : > { %813 = vmatmul.mubr.f32.vlgmr.msra.gmra.mrb[0].mxu1 %v924_v9 }
 0x137   : > { %880 = vmatpush3.bf16.msra.mxu1 %v879_v8  ;;  %819 = vmatprep.mubr.msk.f32.mxu1 %vm990_vm2, %v991_v5 }
 0x13a   : > { %820 = vmatmul.mubr.msk.f32.vlgmr.msra.gmra.mrb[2].mxu1 %vm292_vm0, %v1125_v13 }
 0x209   : > { %v522_v10 = vpop.f32.mrb[0].mxu1 }
 0x20a   : > { %v814_v11 = vpop.f32.mrb[1].mxu1 }
 0x20d   : > { %v592_v12 = vpop.f32.mrb[2].mxu1 }
 0x20e   : > { %v593_v15 = vadd.f32 %v592_v12, %v522_v10  ;;  %v821_v16 = vpop.f32.mrb[3].mxu1 }
 0x210   : > { %v603_v17 = vadd.f32 %v703_v14, %v593_v15 }
 0x212   : > { %604 = vst [vmem:[%s269_s8] sm:$0xff] %v603_v17 }
 0x213   : > { %938 = shalt.err (!%p935_p3)
}
 0x214   : > { %s939_s17 = scalar_lea.hbm %s1256_s15, 128  ;;  %s943_s23 = scalar_lea.hbm %s1305_s7, 384 }
 0x215   : > { %p940_p4 = scmp.ne.s32.totalorder %s1256_s15, %s939_s17  ;;  %p944_p9 = scmp.lt.u32.totalorder %s1256_s15, %s1305_s7 }
 0x216   : > { %p945_p10 = scmp.lt.u32.totalorder %s943_s23, %s939_s17  ;;  %p947_p12 = scmp.lt.u32.totalorder %s939_s17, %s1256_s15 }
 0x217   : > { %p941_p7 = pnand %p940_p4, %p1071_p5 }
 0x218   : > { %p946_p11 = por %p945_p10, %p944_p9 }
 0x219   : > { %p942_p8 = pneg %p941_p7 }
 0x21a   : > { %p948_p13 = por %p947_p12, %p946_p11 }
 0x21c   : > { %p949_p0 = pnand %p948_p13, %p942_p8 }
 0x21e   : > { %952 = shalt.err (!%p949_p0)
}
 0x21f   : > { %881 = dma.vmem_to_hbm [thread:$0]  (%p1071_p5), %s1258_s9, 128, %s1256_s15, %s606_s16  }
 0x220 PF: > { %p887_p1 = scmp.ge.s32.totalorder %s987_s27, 2  ;;  %s631_s13 = sand.u32 1, %s975_s24  }
 0x221   : > { %s632_s14 = scalar_lea.sflag [#allocation3], %s631_s13 }
 0x222   : > { %p884_p2 = pnand %p887_p1, %p1075_p6 }
 0x224   : > { %970 = dma.done.wait (!%p884_p2), %s632_s14, 128  }
 0x225   : > { %972 = vsyncadd (!%p884_p2), %s632_s14, 4294967168  ;;  %p17_p3 = scmp.ge.s32.totalorder %s1058_s30, 5   ;;  %s1310_s24 = smov %s979_s25 }
 0x226   : > { %s1311_s25 = smov %s983_s26  ;;  %s1312_s26 = smov %s1069_s10 }
 0x227   : > { %s1313_s27 = smov %s1058_s30  ;;  %19 = sbr.rel (!%p17_p3) target bundleno = 3 (0x3), region = 83 }
 0x22e   :  { %637 = vsyncpa [#allocation3], 1 }
 0x22f   :  { %639 = vsyncpa [#allocation3 + $0x1], 1 }

</bundles_post_ra>
